<compile_context>
chip_gen: v6e
topology: v6e:2x2x1
jax: 0.10.0
libtpu: 0.0.40
codegen_flags: <defaults>
</compile_context>

<pallas_src>
import numpy as np
import jax
import jax.numpy as jnp
from jax.experimental import pallas as pl
from jax.experimental.pallas import tpu as pltpu


def _round_up(x, m):
    return ((x + m - 1) // m) * m


def _leaky_relu(x, negative_slope=0.2):
    return jnp.where(x > 0, x, negative_slope * x)


def decoder_mlp_kernel(x_ref, w1_ref, b1_ref, w2_ref, b2_ref, w3_ref, b3_ref,
                       o_ref):
    """Fused 3-layer MLP tile: matmuls on the MXU, bias+LeakyReLU on the VPU.

    Shapes per grid step (i = batch tile, j = output-N tile):
      x_ref : (TB, d_in_p)     w1_ref: (d_in_p, H1)   b1_ref: (1, H1)
      w2_ref: (H1, H2)         b2_ref: (1, H2)
      w3_ref: (H2, TN)         b3_ref: (1, TN)
      o_ref : (TB, TN)
    """
    x = x_ref[...]

    h1 = jnp.dot(x, w1_ref[...], preferred_element_type=jnp.float32)
    h1 = _leaky_relu(h1 + b1_ref[...], 0.2)

    h2 = jnp.dot(h1.astype(w2_ref.dtype), w2_ref[...],
                 preferred_element_type=jnp.float32)
    h2 = _leaky_relu(h2 + b2_ref[...], 0.2)

    h3 = jnp.dot(h2.astype(w3_ref.dtype), w3_ref[...],
                 preferred_element_type=jnp.float32)
    h3 = h3 + b3_ref[...]

    o_ref[...] = h3.astype(o_ref.dtype)


def my_decoder_forward(x, params, x_dim, *, weight_dtype=jnp.float32,
                       batch_tile=256, n_tile=512):
    """Runs the MyDecoder forward pass with a batch/N-tiled Pallas kernel.

    x: (B, *dec_in_dim) float32
    params: dict with w1 (D_in, H1), b1 (1, H1), w2 (H1, H2), b2 (1, H2),
            w3 (H2, prod(x_dim)), b3 (1, prod(x_dim))   [(in, out) layout]
    weight_dtype: jnp.float32 (exact) or jnp.bfloat16 (faster on v6e/v7x;
                  accumulation stays f32).
    returns: (B, *x_dim) float32
    """
    B = x.shape[0]
    d_in = int(np.prod(x.shape[1:]))
    d_out = int(np.prod(x_dim))
    h1_dim = params["w1"].shape[1]      # 256
    h2_dim = params["w2"].shape[1]      # 128

    x2d = x.reshape(B, d_in).astype(jnp.float32)        # nn.Flatten()

    # ---- padding for lane-dense (multiple-of-128) loads/stores -------------
    d_in_p = _round_up(d_in, 128)
    TN = n_tile if d_out > n_tile else _round_up(d_out, 128)
    d_out_p = _round_up(d_out, TN)

    B8 = _round_up(B, 8)                # sublane multiple
    TB = min(batch_tile, B8)
    B_pad = _round_up(B8, TB)

    x_p = jnp.pad(x2d, ((0, B_pad - B), (0, d_in_p - d_in)))
    w1_p = jnp.pad(params["w1"].astype(weight_dtype),
                   ((0, d_in_p - d_in), (0, 0)))
    w2 = params["w2"].astype(weight_dtype)
    w3_p = jnp.pad(params["w3"].astype(weight_dtype),
                   ((0, 0), (0, d_out_p - d_out)))
    b1 = params["b1"].astype(jnp.float32)
    b2 = params["b2"].astype(jnp.float32)
    b3_p = jnp.pad(params["b3"].astype(jnp.float32),
                   ((0, 0), (0, d_out_p - d_out)))

    grid = (B_pad // TB, d_out_p // TN)

    grid_spec = pltpu.PrefetchScalarGridSpec(
        num_scalar_prefetch=0,
        grid=grid,
        in_specs=[
            # activations: tiled over the batch axis
            pl.BlockSpec((TB, d_in_p), lambda i, j: (i, 0)),
            # weights / biases: constant index_map -> resident in VMEM
            pl.BlockSpec((d_in_p, h1_dim), lambda i, j: (0, 0)),
            pl.BlockSpec((1, h1_dim), lambda i, j: (0, 0)),
            pl.BlockSpec((h1_dim, h2_dim), lambda i, j: (0, 0)),
            pl.BlockSpec((1, h2_dim), lambda i, j: (0, 0)),
            # last-layer weight / bias: tiled over the output-N axis
            pl.BlockSpec((h2_dim, TN), lambda i, j: (0, j)),
            pl.BlockSpec((1, TN), lambda i, j: (0, j)),
        ],
        out_specs=pl.BlockSpec((TB, TN), lambda i, j: (i, j)),
    )

    out_p = pl.pallas_call(
        decoder_mlp_kernel,
        out_shape=jax.ShapeDtypeStruct((B_pad, d_out_p), jnp.float32),
        grid_spec=grid_spec,
        compiler_params=pltpu.CompilerParams(
            dimension_semantics=("parallel", "parallel"),
            vmem_limit_bytes=32 * 1024 * 1024,
        ),
    )(x_p, w1_p, b1, w2, b2, w3_p, b3_p)

    # strip padding, then LayerReshape(x_dim); nn.Identity() is a no-op.
    out2d = out_p[:B, :d_out]
    return out2d.reshape((B,) + tuple(x_dim))


def init_params(key, dec_in_dim, x_dim):
    """Deterministic init mimicking nn.Linear default (uniform +-1/sqrt(fan_in)),
    stored in (in_features, out_features) layout so y = x @ W + b."""
    d_in = int(np.prod(dec_in_dim))
    d_out = int(np.prod(x_dim))
    dims = [(d_in, 256), (256, 128), (128, d_out)]
    params = {}
    for i, (fi, fo) in enumerate(dims, start=1):
        key, kw, kb = jax.random.split(key, 3)
        bound = 1.0 / np.sqrt(fi)
        params[f"w{i}"] = jax.random.uniform(
            kw, (fi, fo), jnp.float32, minval=-bound, maxval=bound)
        params[f"b{i}"] = jax.random.uniform(
            kb, (1, fo), jnp.float32, minval=-bound, maxval=bound)
    return params


if __name__ == "__main__":
    # Small shapes: batch=2, dec_in_dim=(8, 4) -> 32 features, x_dim=(1, 16, 16)
    dec_in_dim = (8, 4)
    x_dim = (1, 16, 16)
    B = 2

    key = jax.random.PRNGKey(0)
    key, kx = jax.random.split(key)
    x = jax.random.normal(kx, (B,) + dec_in_dim, jnp.float32)

    params = init_params(key, dec_in_dim, x_dim)

    out = my_decoder_forward(x, params, x_dim)  # f32 weights -> exact check
    out = jax.block_until_ready(out)

    # Pure-JAX reference (same math) to verify the kernel.
    def ref_forward(x):
        h = x.reshape(B, -1)
        h = h @ params["w1"] + params["b1"]
        h = jnp.where(h > 0, h, 0.2 * h)
        h = h @ params["w2"] + params["b2"]
        h = jnp.where(h > 0, h, 0.2 * h)
        h = h @ params["w3"] + params["b3"]
        return h.reshape((B,) + x_dim)

    ref = jax.block_until_ready(ref_forward(x))
    assert out.shape == (B,) + x_dim
    np.testing.assert_allclose(np.asarray(out), np.asarray(ref),
                               rtol=1e-5, atol=1e-5)

    # Exercise the bf16-weight fast path (v6e/v7x) at a looser tolerance.
    out_bf16 = jax.block_until_ready(
        my_decoder_forward(x, params, x_dim, weight_dtype=jnp.bfloat16))
    np.testing.assert_allclose(np.asarray(out_bf16), np.asarray(ref),
                               rtol=2e-2, atol=2e-2)

    print("KERNEL_OK")
</pallas_src>

<mosaic_0001>
module attributes {stable_mosaic.version = 11 : i64} {
  func.func @decoder_mlp_kernel(%arg0: i32, %arg1: i32, %arg2: memref<8x128xf32, #tpu.memory_space<vmem>>, %arg3: memref<128x256xf32, #tpu.memory_space<vmem>>, %arg4: memref<1x256xf32, #tpu.memory_space<vmem>>, %arg5: memref<256x128xf32, #tpu.memory_space<vmem>>, %arg6: memref<1x128xf32, #tpu.memory_space<vmem>>, %arg7: memref<128x256xf32, #tpu.memory_space<vmem>>, %arg8: memref<1x256xf32, #tpu.memory_space<vmem>>, %arg9: memref<8x256xf32, #tpu.memory_space<vmem>>) attributes {dimension_semantics = [#tpu.dimension_semantics<parallel>, #tpu.dimension_semantics<parallel>], iteration_bounds = array<i64: 1, 1>, scalar_prefetch = 0 : i64, scratch_operands = 0 : i64, tpu.core_type = #tpu.core_type<tc>, window_params = [{transform_indices = @transform_0, window_bounds = array<i64: 8, 128>}, {pipeline_mode = #tpu.pipeline_mode<synchronous>, transform_indices = @transform_1, window_bounds = array<i64: 128, 256>}, {pipeline_mode = #tpu.pipeline_mode<synchronous>, transform_indices = @transform_2, window_bounds = array<i64: 1, 256>}, {pipeline_mode = #tpu.pipeline_mode<synchronous>, transform_indices = @transform_3, window_bounds = array<i64: 256, 128>}, {pipeline_mode = #tpu.pipeline_mode<synchronous>, transform_indices = @transform_4, window_bounds = array<i64: 1, 128>}, {transform_indices = @transform_5, window_bounds = array<i64: 128, 256>}, {transform_indices = @transform_6, window_bounds = array<i64: 1, 256>}, {transform_indices = @transform_7, window_bounds = array<i64: 8, 256>}]} {
    %c0 = arith.constant 0 : index
    %c0_0 = arith.constant 0 : index
    %0 = vector.load %arg2[%c0, %c0_0] : memref<8x128xf32, #tpu.memory_space<vmem>>, vector<8x128xf32>
    %c0_1 = arith.constant 0 : index
    %c0_2 = arith.constant 0 : index
    %1 = vector.load %arg3[%c0_1, %c0_2] : memref<128x256xf32, #tpu.memory_space<vmem>>, vector<128x256xf32>
    %cst = arith.constant dense<0.000000e+00> : vector<8x256xf32>
    %2 = tpu.matmul %0, %1, %cst {dimension_numbers = #tpu.dot_dimension_numbers<[1], [0], [0], [1], [0, 0, 1, 1], [], []>} : vector<8x128xf32>, vector<128x256xf32>, vector<8x256xf32> -> vector<8x256xf32>
    %c0_3 = arith.constant 0 : index
    %c0_4 = arith.constant 0 : index
    %3 = vector.load %arg4[%c0_3, %c0_4] : memref<1x256xf32, #tpu.memory_space<vmem>>, vector<1x256xf32>
    %4 = vector.broadcast %3 : vector<1x256xf32> to vector<8x256xf32>
    %5 = arith.addf %2, %4 : vector<8x256xf32>
    %cst_5 = arith.constant 0.000000e+00 : f32
    %6 = vector.broadcast %cst_5 : f32 to vector<8x256xf32>
    %7 = arith.cmpf ogt, %5, %6 : vector<8x256xf32>
    %cst_6 = arith.constant 2.000000e-01 : f32
    %8 = vector.broadcast %cst_6 : f32 to vector<8x256xf32>
    %9 = arith.mulf %8, %5 : vector<8x256xf32>
    %10 = arith.select %7, %5, %9 : vector<8x256xi1>, vector<8x256xf32>
    %c0_7 = arith.constant 0 : index
    %c0_8 = arith.constant 0 : index
    %11 = vector.load %arg5[%c0_7, %c0_8] : memref<256x128xf32, #tpu.memory_space<vmem>>, vector<256x128xf32>
    %cst_9 = arith.constant dense<0.000000e+00> : vector<8x128xf32>
    %12 = tpu.matmul %10, %11, %cst_9 {dimension_numbers = #tpu.dot_dimension_numbers<[1], [0], [0], [1], [0, 0, 1, 1], [], []>} : vector<8x256xf32>, vector<256x128xf32>, vector<8x128xf32> -> vector<8x128xf32>
    %c0_10 = arith.constant 0 : index
    %c0_11 = arith.constant 0 : index
    %13 = vector.load %arg6[%c0_10, %c0_11] : memref<1x128xf32, #tpu.memory_space<vmem>>, vector<1x128xf32>
    %14 = vector.broadcast %13 : vector<1x128xf32> to vector<8x128xf32>
    %15 = arith.addf %12, %14 : vector<8x128xf32>
    %cst_12 = arith.constant 0.000000e+00 : f32
    %16 = vector.broadcast %cst_12 : f32 to vector<8x128xf32>
    %17 = arith.cmpf ogt, %15, %16 : vector<8x128xf32>
    %cst_13 = arith.constant 2.000000e-01 : f32
    %18 = vector.broadcast %cst_13 : f32 to vector<8x128xf32>
    %19 = arith.mulf %18, %15 : vector<8x128xf32>
    %20 = arith.select %17, %15, %19 : vector<8x128xi1>, vector<8x128xf32>
    %c0_14 = arith.constant 0 : index
    %c0_15 = arith.constant 0 : index
    %21 = vector.load %arg7[%c0_14, %c0_15] : memref<128x256xf32, #tpu.memory_space<vmem>>, vector<128x256xf32>
    %cst_16 = arith.constant dense<0.000000e+00> : vector<8x256xf32>
    %22 = tpu.matmul %20, %21, %cst_16 {dimension_numbers = #tpu.dot_dimension_numbers<[1], [0], [0], [1], [0, 0, 1, 1], [], []>} : vector<8x128xf32>, vector<128x256xf32>, vector<8x256xf32> -> vector<8x256xf32>
    %c0_17 = arith.constant 0 : index
    %c0_18 = arith.constant 0 : index
    %23 = vector.load %arg8[%c0_17, %c0_18] : memref<1x256xf32, #tpu.memory_space<vmem>>, vector<1x256xf32>
    %24 = vector.broadcast %23 : vector<1x256xf32> to vector<8x256xf32>
    %25 = arith.addf %22, %24 : vector<8x256xf32>
    %c0_19 = arith.constant 0 : index
    %c0_20 = arith.constant 0 : index
    %26 = vector.load %arg9[%c0_19, %c0_20] : memref<8x256xf32, #tpu.memory_space<vmem>>, vector<8x256xf32>
    tpu.vector_store %arg9[%c0_19, %c0_20], %25 {strides = array<i32>} : memref<8x256xf32, #tpu.memory_space<vmem>>, vector<8x256xf32>,
    return
  }
  func.func @transform_0(%arg0: i32, %arg1: i32) -> (i32, i32) {
    %c0_i32 = arith.constant 0 : i32
    %c0_i32_0 = arith.constant 0 : i32
    return %arg0, %c0_i32 : i32, i32
  }
  func.func @transform_1(%arg0: i32, %arg1: i32) -> (i32, i32) {
    %c0_i32 = arith.constant 0 : i32
    %c0_i32_0 = arith.constant 0 : i32
    %c0_i32_1 = arith.constant 0 : i32
    return %c0_i32, %c0_i32_0 : i32, i32
  }
  func.func @transform_2(%arg0: i32, %arg1: i32) -> (i32, i32) {
    %c0_i32 = arith.constant 0 : i32
    %c0_i32_0 = arith.constant 0 : i32
    %c0_i32_1 = arith.constant 0 : i32
    return %c0_i32, %c0_i32_0 : i32, i32
  }
  func.func @transform_3(%arg0: i32, %arg1: i32) -> (i32, i32) {
    %c0_i32 = arith.constant 0 : i32
    %c0_i32_0 = arith.constant 0 : i32
    %c0_i32_1 = arith.constant 0 : i32
    return %c0_i32, %c0_i32_0 : i32, i32
  }
  func.func @transform_4(%arg0: i32, %arg1: i32) -> (i32, i32) {
    %c0_i32 = arith.constant 0 : i32
    %c0_i32_0 = arith.constant 0 : i32
    %c0_i32_1 = arith.constant 0 : i32
    return %c0_i32, %c0_i32_0 : i32, i32
  }
  func.func @transform_5(%arg0: i32, %arg1: i32) -> (i32, i32) {
    %c0_i32 = arith.constant 0 : i32
    %c0_i32_0 = arith.constant 0 : i32
    return %c0_i32, %arg1 : i32, i32
  }
  func.func @transform_6(%arg0: i32, %arg1: i32) -> (i32, i32) {
    %c0_i32 = arith.constant 0 : i32
    %c0_i32_0 = arith.constant 0 : i32
    return %c0_i32, %arg1 : i32, i32
  }
  func.func @transform_7(%arg0: i32, %arg1: i32) -> (i32, i32) {
    %c0_i32 = arith.constant 0 : i32
    return %arg0, %arg1 : i32, i32
  }
}

</mosaic_0001>

<bundles_post_ra>
// kernel: tpu_custom_call.1
= control target key start
LH: loop header
LB: loop body
LE: loop exit
PB: predicated region body
PF: predicated region fallthrough
CT: control target
= control target key end

     0   :  { %12 = vsyncpa [#allocation3], 0  ;;  %s684_s0 = inlined_call_operand.hbm [shape: f32[8,128], index: 0, kind: input, shape index: {}]   ;;  %s685_s1 = inlined_call_operand.hbm [shape: f32[128,256], index: 1, kind: input, shape index: {}]   ;;  %s686_s2 = inlined_call_operand.vmem [shape: f32[1,256], index: 2, kind: input, shape index: {}]   ;;  %s687_s3 = inlined_call_operand.hbm [shape: f32[256,128], index: 3, kind: input, shape index: {}]   ;;  %s688_s4 = inlined_call_operand.vmem [shape: f32[1,128], index: 4, kind: input, shape index: {}]   ;;  %s689_s5 = inlined_call_operand.hbm [shape: f32[128,256], index: 5, kind: input, shape index: {}]   ;;  %s690_s6 = inlined_call_operand.vmem [shape: f32[1,256], index: 6, kind: input, shape index: {}]   ;;  %s691_s7 = inlined_call_operand.hbm [shape: f32[8,256], index: 7, kind: output, shape index: {}]  }
   0x1   :  { %13 = vsyncpa [#allocation6], 0 }
   0x2   :  { %14 = vsyncpa [#allocation9], 0 }
   0x3   :  { %15 = vsyncpa [#allocation4], 0  ;;  %s602_s24 = smov [#allocation5]  }
   0x4   :  { %s31_s25 = sshll.u32 %s602_s24, 4  ;;  %s32_s25 = int_to_ptr.vmem [resolvable:$true] %s31_s25 }
   0x5   :  { %s502_s26 = scalar_lea.vmem %s32_s25, 4096  ;;  %p507_p1 = scmp.lt.s32.totalorder %s32_s25, %s32_s25 }
   0x6   :  { %p503_p0 = scmp.ne.s32.totalorder %s32_s25, %s502_s26  ;;  %p508_p2 = scmp.lt.s32.totalorder %s502_s26, %s502_s26 }
   0x8   :  { %p509_p3 = por %p508_p2, %p507_p1 }
   0xa   :  { %p510_p4 = pnand %p509_p3, %p503_p0 }
   0xc   :  { %513 = shalt.err (!%p510_p4)
}
   0xd   :  { %s603_s27 = smov 256   ;;  %s604_s28 = smov 16  }
   0xe   :  { %37 = dma.hbm_to_vmem [thread:$0]  %s685_s1, 4096, %s32_s25, [#allocation6], %s603_s27, %s603_s27, %s604_s28  }
   0xf   :  { %s605_s8 = smov [#allocation2]   ;;  %s606_s10 = smov [#allocation7]  }
  0x10   :  { %s22_s9 = sshll.u32 %s605_s8, 4  ;;  %s45_s11 = sshll.u32 %s606_s10, 4  ;;  %s23_s9 = int_to_ptr.vmem [resolvable:$true] %s22_s9  ;;  %s46_s11 = int_to_ptr.vmem [resolvable:$true] %s45_s11 }
  0x11   :  { %s522_s12 = scalar_lea.vmem %s23_s9, 128  ;;  %p527_p6 = scmp.lt.s32.totalorder %s23_s9, %s23_s9 }
  0x12   :  { %p523_p5 = scmp.ne.s32.totalorder %s23_s9, %s522_s12  ;;  %p528_p7 = scmp.lt.s32.totalorder %s522_s12, %s522_s12 }
  0x14   :  { %p529_p8 = por %p528_p7, %p527_p6 }
  0x16   :  { %p530_p9 = pnand %p529_p8, %p523_p5 }
  0x18   :  { %533 = shalt.err (!%p530_p9)
}
  0x19   :  { %25 = dma.hbm_to_vmem [thread:$0]  %s684_s0, 128, %s23_s9, [#allocation3]  }
  0x1a   :  { %s542_s15 = scalar_lea.vmem %s46_s11, 4096  ;;  %p547_p11 = scmp.lt.s32.totalorder %s46_s11, %s46_s11 }
  0x1b   :  { %p543_p10 = scmp.ne.s32.totalorder %s46_s11, %s542_s15  ;;  %p548_p12 = scmp.lt.s32.totalorder %s542_s15, %s542_s15 }
  0x1d   :  { %p549_p13 = por %p548_p12, %p547_p11 }
  0x1f   :  { %p550_p0 = pnand %p549_p13, %p543_p10 }
  0x21   :  { %553 = shalt.err (!%p550_p0)
}
  0x22   :  { %s607_s1 = smov 128   ;;  %s608_s16 = smov 8  }
  0x23   :  { %51 = dma.hbm_to_vmem [thread:$0]  %s687_s3, 4096, %s46_s11, [#allocation6], %s607_s1, %s607_s1, %s608_s16  }
  0x24   :  { %s609_s19 = smov [#allocation8]  }
  0x25   :  { %s59_s20 = sshll.u32 %s609_s19, 4  ;;  %s60_s20 = int_to_ptr.vmem [resolvable:$true] %s59_s20 }
  0x26   :  { %s562_s21 = scalar_lea.vmem %s60_s20, 4096  ;;  %p567_p2 = scmp.lt.s32.totalorder %s60_s20, %s60_s20 }
  0x27   :  { %p563_p1 = scmp.ne.s32.totalorder %s60_s20, %s562_s21  ;;  %p568_p3 = scmp.lt.s32.totalorder %s562_s21, %s562_s21 }
  0x29   :  { %p569_p4 = por %p568_p3, %p567_p2 }
  0x2b   :  { %p570_p5 = pnand %p569_p4, %p563_p1 }
  0x2d   :  { %573 = shalt.err (!%p570_p5)
}
  0x2e   :  { %65 = dma.hbm_to_vmem [thread:$0]  %s689_s5, 4096, %s60_s20, [#allocation9], %s603_s27, %s603_s27, %s604_s28  }
  0x2f   :  { %594 = dma.done.wait [#allocation3], 128  }
  0x30   :  { %595 = vsyncadd [#allocation3], 4294967168 }
  0x31   :  { %596 = dma.done.wait [#allocation6], 8192  }
  0x32   :  { %597 = vsyncadd [#allocation6], 4294959104 }
  0x33   :  { %598 = dma.done.wait [#allocation9], 4096  }
  0x34   :  { %599 = vsyncadd [#allocation9], 4294963200  ;;  %v610_v0 = vmov 0.0   ;;  %v112_v1 = vld [vmem:[#allocation5 + $0xf8] sm:$0xff]  ;;  %v111_v2 = vld [vmem:[#allocation5 + $0xf0] sm:$0xff]  ;;  %s611_s26 = smov [#allocation10]  }
  0x35   :  { %189 = vmatprep.mubr.f32.mxu0 %v610_v0  ;;  %v110_v3 = vld [vmem:[#allocation5 + $0xe8] sm:$0xff]  ;;  %125 = vmatprep.subr.mxu0 %v112_v1  ;;  %v109_v4 = vld [vmem:[#allocation5 + $0xe0] sm:$0xff]  ;;  %v108_v5 = vld [vmem:[#allocation5 + $0xd8] sm:$0xff]  ;;  %s437_s27 = sshll.u32 %s611_s26, 4  ;;  %s438_s27 = int_to_ptr.vmem [resolvable:$true] %s437_s27 }
  0x36   :  { %126 = vmatpush1.msra.mxu0 %v111_v2  ;;  %v107_v6 = vld [vmem:[#allocation5 + $0xd0] sm:$0xff]  ;;  %v106_v7 = vld [vmem:[#allocation5 + $0xc8] sm:$0xff]  ;;  %v105_v8 = vld [vmem:[#allocation5 + $0xc0] sm:$0xff]  ;;  %p579_p7 = scmp.lt.s32.totalorder %s438_s27, %s438_s27 }
  0x37   :  { %127 = vmatprep.subr.mxu0 %v110_v3  ;;  %v104_v9 = vld [vmem:[#allocation5 + $0xb8] sm:$0xff]  ;;  %v103_v10 = vld [vmem:[#allocation5 + $0xb0] sm:$0xff]  ;;  %v102_v11 = vld [vmem:[#allocation5 + $0xa8] sm:$0xff] }
  0x38   :  { %128 = vmatpush1.msra.mxu0 %v109_v4  ;;  %v101_v12 = vld [vmem:[#allocation5 + $0xa0] sm:$0xff]  ;;  %v100_v13 = vld [vmem:[#allocation5 + $0x98] sm:$0xff]  ;;  %v99_v14 = vld [vmem:[#allocation5 + $0x90] sm:$0xff] }
  0x39   :  { %129 = vmatprep.subr.mxu0 %v108_v5  ;;  %v233_v15 = vld [vmem:[#allocation7 + $0xf8] sm:$0xff]  ;;  %v232_v17 = vld [vmem:[#allocation7 + $0xf0] sm:$0xff]  ;;  %v98_v18 = vld [vmem:[#allocation5 + $0x88] sm:$0xff] }
  0x3a   :  { %130 = vmatpush1.msra.mxu0 %v107_v6  ;;  %v217_v16 = vld [vmem:[#allocation7 + $0x78] sm:$0xff]  ;;  %449 = vmatprep.subr.mxu1 %v233_v15  ;;  %v216_v19 = vld [vmem:[#allocation7 + $0x70] sm:$0xff]  ;;  %v97_v20 = vld [vmem:[#allocation5 + $0x80] sm:$0xff] }
  0x3b   :  { %131 = vmatprep.subr.mxu0 %v106_v7  ;;  %450 = vmatpush3.msra.mxu1 %v217_v16  ;;  %v231_v21 = vld [vmem:[#allocation7 + $0xe8] sm:$0xff]  ;;  %v96_v22 = vld [vmem:[#allocation5 + $0x78] sm:$0xff]  ;;  %v95_v24 = vld [vmem:[#allocation5 + $0x70] sm:$0xff] }
  0x3c   :  { %132 = vmatpush1.msra.mxu0 %v105_v8  ;;  %451 = vmatprep.subr.mxu1 %v232_v17  ;;  %v215_v23 = vld [vmem:[#allocation7 + $0x68] sm:$0xff]  ;;  %v230_v25 = vld [vmem:[#allocation7 + $0xe0] sm:$0xff]  ;;  %v229_v29 = vld [vmem:[#allocation7 + $0xd8] sm:$0xff] }
  0x3d   :  { %133 = vmatprep.subr.mxu0 %v104_v9  ;;  %452 = vmatpush3.msra.mxu1 %v216_v19  ;;  %v94_v26 = vld [vmem:[#allocation5 + $0x68] sm:$0xff]  ;;  %v214_v27 = vld [vmem:[#allocation7 + $0x60] sm:$0xff]  ;;  %v92_v30 = vld [vmem:[#allocation5 + $0x58] sm:$0xff] }
  0x3e   :  { %134 = vmatpush1.msra.mxu0 %v103_v10  ;;  %453 = vmatprep.subr.mxu1 %v231_v21  ;;  %v93_v28 = vld [vmem:[#allocation5 + $0x60] sm:$0xff]  ;;  %v213_v31 = vld [vmem:[#allocation7 + $0x58] sm:$0xff]  ;;  %v91_v32 = vld [vmem:[#allocation5 + $0x50] sm:$0xff] }
  0x3f   :  { %135 = vmatprep.subr.mxu0 %v102_v11  ;;  %454 = vmatpush3.msra.mxu1 %v215_v23  ;;  %v228_v33 = vld [vmem:[#allocation7 + $0xd0] sm:$0xff]  ;;  %v90_v34 = vld [vmem:[#allocation5 + $0x48] sm:$0xff]  ;;  %v89_v36 = vld [vmem:[#allocation5 + $0x40] sm:$0xff] }
  0x40   :  { %136 = vmatpush1.msra.mxu0 %v101_v12  ;;  %455 = vmatprep.subr.mxu1 %v230_v25  ;;  %v212_v35 = vld [vmem:[#allocation7 + $0x50] sm:$0xff]  ;;  %v227_v37 = vld [vmem:[#allocation7 + $0xc8] sm:$0xff]  ;;  %v88_v38 = vld [vmem:[#allocation5 + $0x38] sm:$0xff] }
  0x41   :  { %137 = vmatprep.subr.mxu0 %v100_v13  ;;  %456 = vmatpush3.msra.mxu1 %v214_v27  ;;  %v211_v39 = vld [vmem:[#allocation7 + $0x48] sm:$0xff]  ;;  %v87_v40 = vld [vmem:[#allocation5 + $0x30] sm:$0xff]  ;;  %v226_v41 = vld [vmem:[#allocation7 + $0xc0] sm:$0xff] }
  0x42   :  { %138 = vmatpush1.msra.mxu0 %v99_v14  ;;  %457 = vmatprep.subr.mxu1 %v229_v29  ;;  %v86_v42 = vld [vmem:[#allocation5 + $0x28] sm:$0xff]  ;;  %v210_v43 = vld [vmem:[#allocation7 + $0x40] sm:$0xff]  ;;  %v225_v45 = vld [vmem:[#allocation7 + $0xb8] sm:$0xff] }
  0x43   :  { %139 = vmatprep.subr.mxu0 %v98_v18  ;;  %458 = vmatpush3.msra.mxu1 %v213_v31  ;;  %v85_v44 = vld [vmem:[#allocation5 + $0x20] sm:$0xff]  ;;  %v84_v46 = vld [vmem:[#allocation5 + $0x18] sm:$0xff]  ;;  %v83_v48 = vld [vmem:[#allocation5 + $0x10] sm:$0xff] }
  0x44   :  { %140 = vmatpush1.msra.mxu0 %v97_v20  ;;  %459 = vmatprep.subr.mxu1 %v228_v33  ;;  %v209_v47 = vld [vmem:[#allocation7 + $0x38] sm:$0xff]  ;;  %v224_v49 = vld [vmem:[#allocation7 + $0xb0] sm:$0xff]  ;;  %v82_v50 = vld [vmem:[#allocation5 + $0x8] sm:$0xff] }
  0x45   :  { %141 = vmatprep.subr.mxu0 %v96_v22  ;;  %460 = vmatpush3.msra.mxu1 %v212_v35  ;;  %v208_v51 = vld [vmem:[#allocation7 + $0x30] sm:$0xff]  ;;  %v81_v52 = vld [vmem:[#allocation5] sm:$0xff]  ;;  %v223_v53 = vld [vmem:[#allocation7 + $0xa8] sm:$0xff] }
  0x46   :  { %142 = vmatpush1.msra.mxu0 %v95_v24  ;;  %461 = vmatprep.subr.mxu1 %v227_v37  ;;  %v80_v54 = vld [vmem:[#allocation2] sm:$0xff]  ;;  %v207_v55 = vld [vmem:[#allocation7 + $0x28] sm:$0xff]  ;;  %v222_v56 = vld [vmem:[#allocation7 + $0xa0] sm:$0xff]  ;;  %v115_v24 = vlaneseq }
  0x47   :  { %143 = vmatprep.subr.mxu0 %v94_v26  ;;  %462 = vmatpush3.msra.mxu1 %v211_v39  ;;  %v206_v57 = vld [vmem:[#allocation7 + $0x20] sm:$0xff]  ;;  %v221_v58 = vld [vmem:[#allocation7 + $0x98] sm:$0xff]  ;;  %v220_v60 = vld [vmem:[#allocation7 + $0x90] sm:$0xff] }
  0x48   :  { %144 = vmatpush1.msra.mxu0 %v93_v28  ;;  %463 = vmatprep.subr.mxu1 %v226_v41  ;;  %v205_v59 = vld [vmem:[#allocation7 + $0x18] sm:$0xff]  ;;  %v204_v61 = vld [vmem:[#allocation7 + $0x10] sm:$0xff]  ;;  %v219_v62 = vld [vmem:[#allocation7 + $0x88] sm:$0xff]  ;;  %v116_v25 = vshrl.u32 %v115_v24, 7 }
  0x49   :  { %145 = vmatprep.subr.mxu0 %v92_v30  ;;  %464 = vmatpush3.msra.mxu1 %v210_v43  ;;  %v203_v63 = vld [vmem:[#allocation7 + $0x8] sm:$0xff]  ;;  %v218_v1 = vld [vmem:[#allocation7 + $0x80] sm:$0xff]  ;;  %v345_v3 = vld [vmem:[#allocation8 + $0xf8] sm:$0xff] }
  0x4a   :  { %146 = vmatpush1.msra.mxu0 %v91_v32  ;;  %465 = vmatprep.subr.mxu1 %v225_v45  ;;  %v202_v2 = vld [vmem:[#allocation7] sm:$0xff]  ;;  %v343_v4 = vld [vmem:[#allocation8 + $0xe8] sm:$0xff]  ;;  %v341_v6 = vld [vmem:[#allocation8 + $0xd8] sm:$0xff]  ;;  %v117_v26 = vsub.s32 0, %v116_v25  ;;  %v121_v28 = vsub.s32 1, %v116_v25 }
  0x4b   :  { %147 = vmatprep.subr.mxu0 %v90_v34  ;;  %466 = vmatpush3.msra.mxu1 %v209_v47  ;;  %v342_v5 = vld [vmem:[#allocation8 + $0xe0] sm:$0xff]  ;;  %v340_v7 = vld [vmem:[#allocation8 + $0xd0] sm:$0xff]  ;;  %v339_v8 = vld [vmem:[#allocation8 + $0xc8] sm:$0xff] }
  0x4c   :  { %148 = vmatpush1.msra.mxu0 %v89_v36  ;;  %467 = vmatprep.subr.mxu1 %v224_v49  ;;  %v338_v9 = vld [vmem:[#allocation8 + $0xc0] sm:$0xff]  ;;  %v337_v10 = vld [vmem:[#allocation8 + $0xb8] sm:$0xff]  ;;  %v336_v11 = vld [vmem:[#allocation8 + $0xb0] sm:$0xff] }
  0x4d   :  { %149 = vmatprep.subr.mxu0 %v88_v38  ;;  %468 = vmatpush3.msra.mxu1 %v208_v51  ;;  %v335_v12 = vld [vmem:[#allocation8 + $0xa8] sm:$0xff]  ;;  %v334_v13 = vld [vmem:[#allocation8 + $0xa0] sm:$0xff]  ;;  %v333_v14 = vld [vmem:[#allocation8 + $0x98] sm:$0xff] }
  0x4e   :  { %150 = vmatpush1.msra.mxu0 %v87_v40  ;;  %469 = vmatprep.subr.mxu1 %v223_v53  ;;  %v332_v15 = vld [vmem:[#allocation8 + $0x90] sm:$0xff]  ;;  %v331_v16 = vld [vmem:[#allocation8 + $0x88] sm:$0xff]  ;;  %v330_v17 = vld [vmem:[#allocation8 + $0x80] sm:$0xff] }
  0x4f   :  { %151 = vmatprep.subr.mxu0 %v86_v42  ;;  %470 = vmatpush3.msra.mxu1 %v207_v55  ;;  %v329_v18 = vld [vmem:[#allocation8 + $0x78] sm:$0xff]  ;;  %v328_v19 = vld [vmem:[#allocation8 + $0x70] sm:$0xff]  ;;  %v327_v20 = vld [vmem:[#allocation8 + $0x68] sm:$0xff] }
  0x50   :  { %152 = vmatpush1.msra.mxu0 %v85_v44  ;;  %471 = vmatprep.subr.mxu1 %v222_v56  ;;  %v326_v21 = vld [vmem:[#allocation8 + $0x60] sm:$0xff]  ;;  %v325_v22 = vld [vmem:[#allocation8 + $0x58] sm:$0xff]  ;;  %v324_v23 = vld [vmem:[#allocation8 + $0x50] sm:$0xff] }
  0x51   :  { %153 = vmatprep.subr.mxu0 %v84_v46  ;;  %472 = vmatpush3.msra.mxu1 %v206_v57  ;;  %v113_v27 = vld [vmem:[%s686_s2] sm:$0x3]  ;;  %v323_v39 = vld [vmem:[#allocation8 + $0x48] sm:$0xff]  ;;  %v322_v40 = vld [vmem:[#allocation8 + $0x40] sm:$0xff] }
  0x52   :  { %154 = vmatpush1.msra.mxu0 %v83_v48  ;;  %473 = vmatprep.subr.mxu1 %v221_v58  ;;  %v118_v29 = vrot.slane %v113_v27, %v117_v26  ;;  %v122_v30 = vrot.slane %v113_v27, %v121_v28  ;;  %v321_v41 = vld [vmem:[#allocation8 + $0x38] sm:$0xff]  ;;  %v320_v42 = vld [vmem:[#allocation8 + $0x30] sm:$0xff]  ;;  %v319_v43 = vld [vmem:[#allocation8 + $0x28] sm:$0xff] }
  0x53   :  { %155 = vmatprep.subr.mxu0 %v82_v50  ;;  %474 = vmatpush3.msra.mxu1 %v205_v59  ;;  %v318_v44 = vld [vmem:[#allocation8 + $0x20] sm:$0xff]  ;;  %v317_v45 = vld [vmem:[#allocation8 + $0x18] sm:$0xff]  ;;  %v316_v46 = vld [vmem:[#allocation8 + $0x10] sm:$0xff] }
  0x54   :  { %156 = vmatpush1.msra.mxu0 %v81_v52  ;;  %475 = vmatprep.subr.mxu1 %v220_v60  ;;  %v315_v47 = vld [vmem:[#allocation8 + $0x8] sm:$0xff]  ;;  %v314_v48 = vld [vmem:[#allocation8] sm:$0xff]  ;;  %v448_v50 = vld [vmem:[%s688_s4] ss:$0 sm:$0xff]  ;;  %s574_s4 = scalar_lea.vmem %s438_s27, 256 }
  0x55   :  { %190 = vmatmul.mubr.f32.vlgmr.msra.gmra.mxu0 %v80_v54  ;;  %476 = vmatpush3.msra.mxu1 %v204_v61  ;;  %v346_v56 = vld [vmem:[%s690_s6] sm:$0x3]  ;;  %p575_p6 = scmp.ne.s32.totalorder %s438_s27, %s574_s4  ;;  %p580_p8 = scmp.lt.s32.totalorder %s574_s4, %s574_s4 }
  0x56   :  { %422 = vmatprep.mubr.f32.mxu0 %v610_v0  ;;  %477 = vmatprep.subr.mxu1 %v219_v62  ;;  %v344_v0 = vld [vmem:[#allocation8 + $0xf0] sm:$0xff]  ;;  %v351_v57 = vrot.slane %v346_v56, %v117_v26  ;;  %v355_v58 = vrot.slane %v346_v56, %v121_v28 }
  0x57   :  { %478 = vmatpush3.msra.mxu1 %v203_v63  ;;  %358 = vmatprep.subr.mxu0 %v345_v3  ;;  %p581_p9 = por %p580_p8, %p579_p7 }
  0x58   :  { %479 = vmatprep.subr.mxu1 %v218_v1  ;;  %359 = vmatpush1.msra.mxu0 %v344_v0 }
  0x59   :  { %480 = vmatpush3.msra.mxu1 %v202_v2  ;;  %360 = vmatprep.subr.mxu0 %v343_v4  ;;  %p582_p10 = pnand %p581_p9, %p575_p6 }
  0x5a   :  { %361 = vmatpush1.msra.mxu0 %v342_v5 }
  0x5b   :  { %362 = vmatprep.subr.mxu0 %v341_v6 }
  0x5c   :  { %363 = vmatpush1.msra.mxu0 %v340_v7 }
  0x5d   :  { %364 = vmatprep.subr.mxu0 %v339_v8 }
  0x5e   :  { %365 = vmatpush1.msra.mxu0 %v338_v9 }
  0x5f   :  { %366 = vmatprep.subr.mxu0 %v337_v10 }
  0x60   :  { %367 = vmatpush1.msra.mxu0 %v336_v11 }
  0x61   :  { %368 = vmatprep.subr.mxu0 %v335_v12 }
  0x62   :  { %369 = vmatpush1.msra.mxu0 %v334_v13 }
  0x63   :  { %370 = vmatprep.subr.mxu0 %v333_v14 }
  0x64   :  { %371 = vmatpush1.msra.mxu0 %v332_v15 }
  0x65   :  { %372 = vmatprep.subr.mxu0 %v331_v16 }
  0x66   :  { %373 = vmatpush1.msra.mxu0 %v330_v17 }
  0x67   :  { %374 = vmatprep.subr.mxu0 %v329_v18 }
  0x68   :  { %375 = vmatpush1.msra.mxu0 %v328_v19 }
  0x69   :  { %376 = vmatprep.subr.mxu0 %v327_v20 }
  0x6a   :  { %377 = vmatpush1.msra.mxu0 %v326_v21 }
  0x6b   :  { %378 = vmatprep.subr.mxu0 %v325_v22 }
  0x6c   :  { %379 = vmatpush1.msra.mxu0 %v324_v23 }
  0x6d   :  { %380 = vmatprep.subr.mxu0 %v323_v39 }
  0x6e   :  { %381 = vmatpush1.msra.mxu0 %v322_v40 }
  0x6f   :  { %382 = vmatprep.subr.mxu0 %v321_v41 }
  0x70   :  { %383 = vmatpush1.msra.mxu0 %v320_v42 }
  0x71   :  { %384 = vmatprep.subr.mxu0 %v319_v43 }
  0x72   :  { %385 = vmatpush1.msra.mxu0 %v318_v44 }
  0x73   :  { %386 = vmatprep.subr.mxu0 %v317_v45 }
  0x74   :  { %387 = vmatpush1.msra.mxu0 %v316_v46 }
  0x75   :  { %388 = vmatprep.subr.mxu0 %v315_v47 }
  0x76   :  { %389 = vmatpush1.msra.mxu0 %v314_v48 }
 0x115   :  { %v191_v31 = vpop.f32.mrf.mxu0 }
 0x116   :  { %v192_v32 = vadd.f32 %v191_v31, %v118_v29 }
 0x117   :  { %v193_v33 = vpop.f32.mrf.mxu0 }
 0x118   :  { %v194_v34 = vadd.f32 %v193_v33, %v122_v30  ;;  %v198_v35 = vmul.f32 0.2, %v192_v32  ;;  %vm196_vm1 = vcmp.gt.f32.partialorder %v192_v32, 0.0 }
 0x11a   :  { %vm197_vm0 = vcmp.gt.f32.partialorder %v194_v34, 0.0  ;;  %v199_v36 = vmul.f32 0.2, %v194_v34  ;;  %v200_v38 = vsel %vm196_vm1, %v192_v32, %v198_v35 }
 0x11c   :  { %v201_v37 = vsel %vm197_vm0, %v194_v34, %v199_v36 }
 0x11d   :  { %305 = vmatprep.mubr.f32.mxu1 %v201_v37 }
 0x11e   :  { %306 = vmatmul.mubr.f32.vlgmr.msra.gmra.mxu1 %v200_v38 }
 0x1de   :  { %v481_v49 = vpop.f32.mrf.mxu1 }
 0x1e0   :  { %v482_v51 = vpop.f32.mrf.mxu1 }
 0x1e1   :  { %v483_v52 = vadd.f32 %v482_v51, %v481_v49 }
 0x1e3   :  { %v308_v53 = vadd.f32 %v483_v52, %v448_v50 }
 0x1e5   :  { %v312_v54 = vmul.f32 0.2, %v308_v53  ;;  %vm311_vm2 = vcmp.gt.f32.partialorder %v308_v53, 0.0 }
 0x1e7   :  { %v313_v55 = vsel %vm311_vm2, %v308_v53, %v312_v54 }
 0x1e8   :  { %423 = vmatmul.mubr.f32.vlgmr.msra.gmra.mxu0 %v313_v55 }
 0x2a8   :  { %v424_v59 = vpop.f32.mrf.mxu0 }
 0x2a9   :  { %v425_v60 = vadd.f32 %v424_v59, %v351_v57 }
 0x2aa   :  { %v426_v61 = vpop.f32.mrf.mxu0 }
 0x2ab   :  { %429 = vst [vmem:[#allocation10] sm:$0xff] %v425_v60  ;;  %v427_v62 = vadd.f32 %v426_v61, %v355_v58 }
 0x2ad   :  { %430 = vst [vmem:[#allocation10 + $0x8] sm:$0xff] %v427_v62 }
 0x2ae   :  { %585 = shalt.err (!%p582_p10)
}
 0x2af   :  { %440 = dma.vmem_to_hbm [thread:$0]  %s438_s27, 256, %s691_s7, [#allocation4]  }
 0x2b0   :  { %600 = dma.done.wait [#allocation4], 256  }
 0x2b1   :  { %601 = vsyncadd [#allocation4], 4294967040 }
 0x2b2   :  { %444 = vsyncpa [#allocation3], 1 }
 0x2b3   :  { %445 = vsyncpa [#allocation6], 1 }
 0x2b4   :  { %446 = vsyncpa [#allocation9], 1 }
 0x2b5   :  { %447 = vsyncpa [#allocation4], 1 }

</bundles_post_ra>
